<compile_context>
chip_gen: v7x
topology: tpu7x:2x2x1
jax: 0.10.0
libtpu: 0.0.40
codegen_flags: <defaults>
</compile_context>

<pallas_src>
import functools

import jax
import jax.numpy as jnp
from jax import lax
from jax.experimental import pallas as pl
from jax.experimental.pallas import tpu as pltpu


# ----------------------------- linear kernels ------------------------------

def _qkv_matmul_kernel(x_ref, w_ref, b_ref, o_ref):
    # x: (TN, Cin) bf16, w: (Cout, Cin) bf16, b: (Cout, 1) f32 -> o: (Cout, TN) f32
    o_ref[...] = lax.dot_general(
        w_ref[...], x_ref[...],
        dimension_numbers=(((1,), (1,)), ((), ())),
        preferred_element_type=jnp.float32) + b_ref[...]


def qkv_linear_pallas(x2d, w, b, tile_n=512):
    """Channel-major pointwise conv: returns (Cout, N) = w @ x2d.T + b."""
    N, Cin = x2d.shape
    Cout = w.shape[0]
    TN = min(tile_n, N)
    return pl.pallas_call(
        _qkv_matmul_kernel,
        out_shape=jax.ShapeDtypeStruct((Cout, N), jnp.float32),
        grid=(pl.cdiv(N, TN),),
        in_specs=[
            pl.BlockSpec((TN, Cin), lambda i: (i, 0)),
            pl.BlockSpec((Cout, Cin), lambda i: (0, 0)),
            pl.BlockSpec((Cout, 1), lambda i: (0, 0)),
        ],
        out_specs=pl.BlockSpec((Cout, TN), lambda i: (0, i)),
        compiler_params=pltpu.CompilerParams(
            dimension_semantics=("parallel",)),
    )(x2d.astype(jnp.bfloat16), w.astype(jnp.bfloat16),
      b.reshape(Cout, 1).astype(jnp.float32))


def _proj_matmul_kernel(x_ref, w_ref, b_ref, o_ref):
    # x: (TN, Cin) bf16, w: (Cout, Cin) bf16, b: (1, Cout) f32 -> o: (TN, Cout) f32
    o_ref[...] = lax.dot_general(
        x_ref[...], w_ref[...],
        dimension_numbers=(((1,), (1,)), ((), ())),
        preferred_element_type=jnp.float32) + b_ref[...]


def proj_linear_pallas(x2d, w, b, tile_n=512):
    """Row-major Linear: returns (N, Cout) = x2d @ w.T + b."""
    N, Cin = x2d.shape
    Cout = w.shape[0]
    TN = min(tile_n, N)
    return pl.pallas_call(
        _proj_matmul_kernel,
        out_shape=jax.ShapeDtypeStruct((N, Cout), jnp.float32),
        grid=(pl.cdiv(N, TN),),
        in_specs=[
            pl.BlockSpec((TN, Cin), lambda i: (i, 0)),
            pl.BlockSpec((Cout, Cin), lambda i: (0, 0)),
            pl.BlockSpec((1, Cout), lambda i: (0, 0)),
        ],
        out_specs=pl.BlockSpec((TN, Cout), lambda i: (i, 0)),
        compiler_params=pltpu.CompilerParams(
            dimension_semantics=("parallel",)),
    )(x2d.astype(jnp.bfloat16), w.astype(jnp.bfloat16),
      b.reshape(1, Cout).astype(jnp.float32))


# -------------------- fused unfold + dilate attention ----------------------

def _dilate_attn_kernel(qkv_ref, o_ref, *, dilations, nh, hd, K, P, Wp, Nout,
                        scale):
    """qkv_ref: (3, d, Ntot) padded flat lanes; o_ref: (d, Nout).

    Lane index n = b*Lpp + h*Wp + w (padded-width coords).  Tap (ki,kj) of
    dilation r lives at lane n + (P + ki*r - lo)*Wp + (P + kj*r - lo); q lives
    at lane n + P*(Wp+1).  Zero-padding reproduces nn.Unfold's boundary
    behaviour; lanes at padded positions compute garbage that is sliced away
    by the caller.
    """
    di = pl.program_id(0)
    center = P * Wp + P
    # q (scaled) for all heads, loaded once per grid step.
    q_all = qkv_ref[0, :, pl.ds(center, Nout)] * scale            # (d, Nout)
    q_heads = [q_all[n * hd:(n + 1) * hd, :] for n in range(nh)]

    def branch(r):
        lo = r * (K - 1) // 2
        shifts = [(P + ki * r - lo) * Wp + (P + kj * r - lo)
                  for ki in range(K) for kj in range(K)]
        # pass 1: logits per head / per tap
        logits = [[] for _ in range(nh)]
        for s in shifts:
            ks = qkv_ref[1, :, pl.ds(s, Nout)]                    # (d, Nout)
            for n in range(nh):
                logits[n].append(jnp.sum(
                    q_heads[n] * ks[n * hd:(n + 1) * hd, :],
                    axis=0, keepdims=True))                       # (1, Nout)
        exps, invs = [], []
        for n in range(nh):
            m = functools.reduce(jnp.maximum, logits[n])
            e = [jnp.exp(l - m) for l in logits[n]]
            den = functools.reduce(lambda a, b: a + b, e)
            exps.append(e)
            invs.append(pl.reciprocal(den, approx=True))          # (1, Nout)
        # pass 2: unrolled FMA accumulation of the V taps
        accs = [jnp.zeros((hd, Nout), jnp.float32) for _ in range(nh)]
        for j, s in enumerate(shifts):
            vs = qkv_ref[2, :, pl.ds(s, Nout)]                    # (d, Nout)
            for n in range(nh):
                accs[n] = accs[n] + exps[n][j] * vs[n * hd:(n + 1) * hd, :]
        for n in range(nh):
            o_ref[n * hd:(n + 1) * hd, :] = (
                accs[n] * invs[n]).astype(o_ref.dtype)

    # One statically-unrolled branch per dilation (static shift offsets).
    for bi, r in enumerate(dilations):
        pl.when(di == bi)(functools.partial(branch, r))


def dilate_attention_pallas(qkv_flat, *, dilations, nh, hd, K, P, Wp, Nout,
                            scale):
    """qkv_flat: (3, nd, d, Ntot) f32 -> (nd, d, Nout) f32."""
    _, nd, d, Ntot = qkv_flat.shape
    kern = functools.partial(
        _dilate_attn_kernel, dilations=tuple(dilations), nh=nh, hd=hd,
        K=K, P=P, Wp=Wp, Nout=Nout, scale=scale)
    return pl.pallas_call(
        kern,
        out_shape=jax.ShapeDtypeStruct((nd, d, Nout), jnp.float32),
        grid=(nd,),
        in_specs=[pl.BlockSpec((3, None, d, Ntot), lambda i: (0, i, 0, 0))],
        out_specs=pl.BlockSpec((None, d, Nout), lambda i: (i, 0, 0)),
        compiler_params=pltpu.CompilerParams(
            dimension_semantics=("parallel",)),
    )(qkv_flat)
    # TODO(synk): on v7x, split the lane axis into a second (even) parallel
    # grid axis with halo'd input blocks so both TensorCores are used.


# ------------------------------ forward pass --------------------------------

def multi_dilate_local_attention(x, params, num_heads, kernel_size, dilation,
                                 qk_scale=None):
    """Forward pass of MultiDilateLocalAttention (dropout probs are 0)."""
    B, H, W, C = x.shape
    nd = len(dilation)
    assert C % nd == 0 and num_heads % nd == 0
    assert kernel_size % 2 == 1
    d = C // nd
    head_dim = C // num_heads
    nh = d // head_dim
    scale = qk_scale if qk_scale is not None else head_dim ** (-0.5)
    K = kernel_size
    P = max(dilation) * (K - 1) // 2
    Hpp, Wp = H + 2 * P, W + 2 * P
    Lpp = Hpp * Wp
    N = B * H * W

    # qkv 1x1 conv -> channel-major (3C, N) Pallas matmul (bf16 x bf16 -> f32).
    qkv_cm = qkv_linear_pallas(x.reshape(N, C), params["qkv_w"],
                               params["qkv_b"])                    # (3C, N)

    # Zero-pad spatially once and flatten (B, Hpp, Wp) into the lane axis.
    qkv_sp = qkv_cm.reshape(3, nd, d, B, H, W)
    qkv_sp = jnp.pad(qkv_sp, ((0, 0),) * 4 + ((P, P), (P, P)))
    Nout = B * Lpp
    hi = max(dilation) * ((K - 1) - (K - 1) // 2)
    tail = (P + hi) * (Wp + 1)                 # room for the largest tap shift
    qkv_flat = jnp.pad(qkv_sp.reshape(3, nd, d, Nout),
                       ((0, 0), (0, 0), (0, 0), (0, tail)))

    # Single fused attention call over all dilations / heads / batches.
    attn = dilate_attention_pallas(
        qkv_flat, dilations=dilation, nh=nh, hd=head_dim, K=K, P=P, Wp=Wp,
        Nout=Nout, scale=scale)                                    # (nd, d, Nout)

    # Drop padded lanes, concat channels in (dilation, head, head_dim) order.
    o = attn.reshape(nd, d, B, Hpp, Wp)[:, :, :, :H, :W]
    o = jnp.transpose(o, (2, 3, 4, 0, 1)).reshape(N, C)
    # TODO(synk): the channel-major -> (B*L, C) transpose above is one XLA copy;
    # writing spatial-major directly from the kernel would need in-kernel
    # transposes of the (d, lanes) tiles.

    # proj Linear (+ proj_drop p=0 -> identity).
    y = proj_linear_pallas(o, params["proj_w"], params["proj_b"])
    return y.reshape(B, H, W, C)


# -------------------------- pure-JAX reference ------------------------------

def unfold_nhwc(x, kernel_size, dilation):
    """nn.Unfold(k, dilation, pad=dilation*(k-1)//2, stride=1), NHWC layout."""
    B, H, W, d = x.shape
    p = dilation * (kernel_size - 1) // 2
    xp = jnp.pad(x, ((0, 0), (p, p), (p, p), (0, 0)))
    patches = []
    for ki in range(kernel_size):
        for kj in range(kernel_size):
            patches.append(xp[:, ki * dilation: ki * dilation + H,
                              kj * dilation: kj * dilation + W, :])
    return jnp.stack(patches, axis=3)  # (B, H, W, KK, d)


def reference_forward(x, params, num_heads, kernel_size, dilation):
    B, H, W, C = x.shape
    nd = len(dilation)
    d = C // nd
    head_dim = C // num_heads
    nh = d // head_dim
    scale = head_dim ** (-0.5)
    L = H * W
    KK = kernel_size * kernel_size
    qkv = jnp.einsum("nc,oc->no", x.reshape(B * L, C), params["qkv_w"])
    qkv = (qkv + params["qkv_b"]).reshape(B, H, W, 3, nd, d)
    outs = []
    for i, r in enumerate(dilation):
        q = qkv[..., 0, i, :].reshape(B, L, nh, head_dim)
        k = unfold_nhwc(qkv[..., 1, i, :], kernel_size, r).reshape(
            B, L, KK, nh, head_dim)
        v = unfold_nhwc(qkv[..., 2, i, :], kernel_size, r).reshape(
            B, L, KK, nh, head_dim)
        logits = jnp.einsum("blhc,blkhc->blhk", q, k) * scale
        attn = jax.nn.softmax(logits, axis=-1)
        o = jnp.einsum("blhk,blkhc->blhc", attn, v)
        outs.append(o.reshape(B, H, W, d))
    xc = jnp.stack(outs, axis=3).reshape(B, H, W, C)
    y = jnp.einsum("nc,oc->no", xc.reshape(B * L, C), params["proj_w"])
    return (y + params["proj_b"]).reshape(B, H, W, C)


# --------------------------------- main --------------------------------------

if __name__ == "__main__":
    # dim=24, num_heads=6, dilation=[1,2,3], kernel_size=3 -> head_dim=4,
    # channels per dilation=8, heads per dilation=2.
    B, H, W, C = 2, 8, 8, 24
    num_heads = 6
    kernel_size = 3
    dilation = [1, 2, 3]

    key = jax.random.PRNGKey(0)
    kx, kw1, kw2, kb2 = jax.random.split(key, 4)
    x = jax.random.normal(kx, (B, H, W, C), jnp.float32)

    # PyTorch-native weight layouts: Conv2d/Linear weights are (out, in).
    params = {
        "qkv_w": 0.1 * jax.random.normal(kw1, (3 * C, C), jnp.float32),
        "qkv_b": jnp.zeros((3 * C,), jnp.float32),      # qkv_bias=False
        "proj_w": 0.1 * jax.random.normal(kw2, (C, C), jnp.float32),
        "proj_b": 0.1 * jax.random.normal(kb2, (C,), jnp.float32),
    }

    out = multi_dilate_local_attention(x, params, num_heads, kernel_size,
                                       dilation)
    out = jax.block_until_ready(out)

    ref = reference_forward(x, params, num_heads, kernel_size, dilation)
    assert out.shape == (B, H, W, C)
    # bf16 matmul operands (f32 accumulation) -> relaxed tolerance vs f32 ref.
    assert jnp.allclose(out, ref, atol=5e-2, rtol=5e-2), "Pallas output mismatch"
    print("KERNEL_OK")
</pallas_src>

<mosaic_0001>
module attributes {stable_mosaic.version = 11 : i64} {
  func.func @_qkv_matmul_kernel(%arg0: i32, %arg1: memref<128x24xbf16, #tpu.memory_space<vmem>>, %arg2: memref<72x24xbf16, #tpu.memory_space<vmem>>, %arg3: memref<72x1xf32, #tpu.memory_space<vmem>>, %arg4: memref<72x128xf32, #tpu.memory_space<vmem>>) attributes {dimension_semantics = [#tpu.dimension_semantics<parallel>], iteration_bounds = array<i64: 1>, scalar_prefetch = 0 : i64, scratch_operands = 0 : i64, tpu.core_type = #tpu.core_type<tc>, window_params = [{transform_indices = @transform_0, window_bounds = array<i64: 128, 24>}, {pipeline_mode = #tpu.pipeline_mode<synchronous>, transform_indices = @transform_1, window_bounds = array<i64: 72, 24>}, {pipeline_mode = #tpu.pipeline_mode<synchronous>, transform_indices = @transform_2, window_bounds = array<i64: 72, 1>}, {transform_indices = @transform_3, window_bounds = array<i64: 72, 128>}]} {
    %c0 = arith.constant 0 : index
    %c0_0 = arith.constant 0 : index
    %0 = vector.load %arg2[%c0, %c0_0] : memref<72x24xbf16, #tpu.memory_space<vmem>>, vector<72x24xbf16>
    %c0_1 = arith.constant 0 : index
    %c0_2 = arith.constant 0 : index
    %1 = vector.load %arg1[%c0_1, %c0_2] : memref<128x24xbf16, #tpu.memory_space<vmem>>, vector<128x24xbf16>
    %cst = arith.constant dense<0.000000e+00> : vector<72x128xf32>
    %2 = tpu.matmul %0, %1, %cst {dimension_numbers = #tpu.dot_dimension_numbers<[1], [1], [0], [0], [0, 0, 1, 0], [], []>} : vector<72x24xbf16>, vector<128x24xbf16>, vector<72x128xf32> -> vector<72x128xf32>
    %c0_3 = arith.constant 0 : index
    %c0_4 = arith.constant 0 : index
    %3 = vector.load %arg3[%c0_3, %c0_4] : memref<72x1xf32, #tpu.memory_space<vmem>>, vector<72x1xf32>
    %4 = vector.broadcast %3 : vector<72x1xf32> to vector<72x128xf32>
    %5 = arith.addf %2, %4 : vector<72x128xf32>
    %c0_5 = arith.constant 0 : index
    %c0_6 = arith.constant 0 : index
    %6 = vector.load %arg4[%c0_5, %c0_6] : memref<72x128xf32, #tpu.memory_space<vmem>>, vector<72x128xf32>
    tpu.vector_store %arg4[%c0_5, %c0_6], %5 {strides = array<i32>} : memref<72x128xf32, #tpu.memory_space<vmem>>, vector<72x128xf32>,
    return
  }
  func.func @transform_0(%arg0: i32) -> (i32, i32) {
    %c0_i32 = arith.constant 0 : i32
    %c0_i32_0 = arith.constant 0 : i32
    return %arg0, %c0_i32 : i32, i32
  }
  func.func @transform_1(%arg0: i32) -> (i32, i32) {
    %c0_i32 = arith.constant 0 : i32
    %c0_i32_0 = arith.constant 0 : i32
    %c0_i32_1 = arith.constant 0 : i32
    return %c0_i32, %c0_i32_0 : i32, i32
  }
  func.func @transform_2(%arg0: i32) -> (i32, i32) {
    %c0_i32 = arith.constant 0 : i32
    %c0_i32_0 = arith.constant 0 : i32
    %c0_i32_1 = arith.constant 0 : i32
    return %c0_i32, %c0_i32_0 : i32, i32
  }
  func.func @transform_3(%arg0: i32) -> (i32, i32) {
    %c0_i32 = arith.constant 0 : i32
    %c0_i32_0 = arith.constant 0 : i32
    return %c0_i32, %arg0 : i32, i32
  }
}

</mosaic_0001>

<bundles_post_ra>
// kernel: tpu_custom_call.1
= control target key start
LH: loop header
LB: loop body
LE: loop exit
PB: predicated region body
PF: predicated region fallthrough
CT: control target
= control target key end

     0   :  { %v423_v1 = vmov 0.0   ;;  %vm158_vm0 = vcmask 195584   ;;  %vm424_vm1 = vmmov 0   ;;  %v425_v6 = vmov 0   ;;  %s566_s0 = inlined_call_operand.vmem [shape: bf16[128,24], index: 0, kind: input, shape index: {}]   ;;  %s567_s1 = inlined_call_operand.vmem [shape: bf16[72,24], index: 1, kind: input, shape index: {}]   ;;  %s568_s2 = inlined_call_operand.vmem [shape: f32[72,1], index: 2, kind: input, shape index: {}]   ;;  %s569_s3 = inlined_call_operand.hbm [shape: f32[72,128], index: 3, kind: output, shape index: {}]  }
   0x1   :  { %v386_v0 = vld [vmem:[%s566_s0] sm:$0xff]   ;;  %326 = vmatprep.subr.bf16.mxu0 %v423_v1  ;;  %362 = vmatprep.subr.bf16.mxu1 %v423_v1  ;;  %v387_v3 = vld [vmem:[%s566_s0 + $0x8] sm:$0xff]   ;;  %v388_v5 = vld [vmem:[%s566_s0 + $0x10] sm:$0xff]  }
   0x2   :  { %v175_v2 = vsel %vm158_vm0, %v386_v0, 0  ;;  %v178_v4 = vsel %vm158_vm0, %v387_v3, 0  ;;  %342 = vmatprep.mubr.msk.bf16.mxu0 %vm424_vm1, %v423_v1  ;;  %354 = vmatprep.mubr.msk.bf16.mxu1 %vm424_vm1, %v423_v1  ;;  %v41_v7 = vld [vmem:[%s568_s2] sm:$0xff]  ;;  %v43_v8 = vld [vmem:[%s568_s2 + $0x10] sm:$0xff]  ;;  %v42_v9 = vld [vmem:[%s568_s2 + $0x8] sm:$0xff]  ;;  %v181_v11 = vsel %vm158_vm0, %v388_v5, 0 }
   0x3   :  { %327 = vmatpush3.bf16.xpose.msra.mxu0 %v175_v2  ;;  %370 = vmatpush3.bf16.xpose.msra.mxu1 %v175_v2  ;;  %v44_v10 = vld [vmem:[%s568_s2 + $0x18] sm:$0xff] }
   0x4   :  { %328 = vmatprep.subr.bf16.mxu0 %v423_v1  ;;  %363 = vmatprep.subr.bf16.mxu1 %v423_v1 }
   0x5   :  { %384 = vset.pattern.permute.xlu0 %v425_v6  ;;  %385 = vset.pattern.permute.xlu1 %v425_v6 }
   0x6   :  { %52 = vperm.xlu0 %384, %v41_v7   ;;  %62 = vperm.xlu1 %385, %v43_v8  }
   0xb   :  { %329 = vmatpush3.bf16.xpose.msra.mxu0 %v178_v4  ;;  %371 = vmatpush3.bf16.xpose.msra.mxu1 %v178_v4 }
   0xc   :  { %330 = vmatprep.subr.bf16.mxu0 %v423_v1  ;;  %364 = vmatprep.subr.bf16.mxu1 %v423_v1 }
   0xd   :  { %8 = vsyncpa [#allocation3], 0  ;;  %57 = vperm.xlu0 %384, %v42_v9   ;;  %67 = vperm.xlu1 %385, %v44_v10   ;;  %v45_v12 = vld [vmem:[%s568_s2 + $0x20] sm:$0xff]  ;;  %v46_v13 = vld [vmem:[%s568_s2 + $0x28] sm:$0xff] }
   0xe   :  { %v389_v14 = vld [vmem:[%s566_s0 + $0x18] sm:$0xff]   ;;  %v47_v15 = vld [vmem:[%s568_s2 + $0x30] sm:$0xff]  ;;  %v49_v18 = vld [vmem:[%s568_s2 + $0x40] sm:$0xff] }
   0xf   :  { %v48_v16 = vld [vmem:[%s568_s2 + $0x38] sm:$0xff]  ;;  %v184_v17 = vsel %vm158_vm0, %v389_v14, 0  ;;  %v390_v19 = vld [vmem:[%s566_s0 + $0x20] sm:$0xff]   ;;  %v391_v21 = vld [vmem:[%s566_s0 + $0x28] sm:$0xff]  }
  0x10   :  { %v187_v20 = vsel %vm158_vm0, %v390_v19, 0  ;;  %v190_v22 = vsel %vm158_vm0, %v391_v21, 0  ;;  %v392_v23 = vld [vmem:[%s566_s0 + $0x30] sm:$0xff]   ;;  %v393_v25 = vld [vmem:[%s566_s0 + $0x38] sm:$0xff]   ;;  %v394_v27 = vld [vmem:[%s567_s1] sm:$0xff]  }
  0x11   :  { %72 = vperm.xlu0 %384, %v45_v12   ;;  %77 = vperm.xlu1 %385, %v46_v13   ;;  %v193_v24 = vsel %vm158_vm0, %v392_v23, 0  ;;  %v196_v26 = vsel %vm158_vm0, %v393_v25, 0  ;;  %v395_v28 = vld [vmem:[%s567_s1 + $0x18] sm:$0xff]   ;;  %v396_v29 = vld [vmem:[%s567_s1 + $0x8] sm:$0xff]   ;;  %v397_v30 = vld [vmem:[%s567_s1 + $0x20] ss:$0 sps:$4 sm:$0xff]  }
  0x12   :  { %v398_v31 = vld [vmem:[%s567_s1 + $0x10] sm:$0xff]   ;;  %s426_s1 = smov [#allocation2]  }
  0x13   :  { %331 = vmatpush3.bf16.xpose.msra.mxu0 %v181_v11  ;;  %372 = vmatpush3.bf16.xpose.msra.mxu1 %v181_v11  ;;  %s284_s27 = sshll.u32 %s426_s1, 4  ;;  %s285_s27 = int_to_ptr.vmem [resolvable:$true] %s284_s27 }
  0x14   :  { %332 = vmatprep.subr.bf16.mxu0 %v423_v1  ;;  %365 = vmatprep.subr.bf16.mxu1 %v423_v1  ;;  %s399_s28 = scalar_lea.vmem %s285_s27, 1152  ;;  %p404_p1 = scmp.lt.s32.totalorder %s285_s27, %s285_s27 }
  0x15   :  { %82 = vperm.xlu0 %384, %v47_v15   ;;  %87 = vperm.xlu1 %385, %v48_v16   ;;  %p400_p0 = scmp.ne.s32.totalorder %s285_s27, %s399_s28  ;;  %p405_p2 = scmp.lt.s32.totalorder %s399_s28, %s399_s28 }
  0x17   :  { %p406_p3 = por %p405_p2, %p404_p1 }
  0x19   :  { %92 = vperm.xlu0 %384, %v49_v18   ;;  %p407_p4 = pnand %p406_p3, %p400_p0 }
  0x1b   :  { %333 = vmatpush3.bf16.xpose.msra.mxu0 %v184_v17  ;;  %373 = vmatpush3.bf16.xpose.msra.mxu1 %v184_v17 }
  0x1c   :  { %334 = vmatprep.subr.bf16.mxu0 %v423_v1  ;;  %366 = vmatprep.subr.bf16.mxu1 %v423_v1 }
  0x23   :  { %335 = vmatpush3.bf16.xpose.msra.mxu0 %v187_v20  ;;  %374 = vmatpush3.bf16.xpose.msra.mxu1 %v187_v20 }
  0x24   :  { %336 = vmatprep.subr.bf16.mxu0 %v423_v1  ;;  %367 = vmatprep.subr.bf16.mxu1 %v423_v1 }
  0x2b   :  { %337 = vmatpush3.bf16.xpose.msra.mxu0 %v190_v22  ;;  %375 = vmatpush3.bf16.xpose.msra.mxu1 %v190_v22 }
  0x2c   :  { %338 = vmatprep.subr.bf16.mxu0 %v423_v1  ;;  %368 = vmatprep.subr.bf16.mxu1 %v423_v1 }
  0x33   :  { %339 = vmatpush3.bf16.xpose.msra.mxu0 %v193_v24  ;;  %376 = vmatpush3.bf16.xpose.msra.mxu1 %v193_v24 }
  0x34   :  { %340 = vmatprep.subr.bf16.mxu0 %v423_v1  ;;  %369 = vmatprep.subr.bf16.mxu1 %v423_v1 }
  0x3b   :  { %341 = vmatpush3.bf16.xpose.msra.mxu0 %v196_v26  ;;  %377 = vmatpush3.bf16.xpose.msra.mxu1 %v196_v26 }
  0x42   :  { %343 = vmatmul.mubr.msk.bf16.vlgmr.msra.gmra.mrb[0].mxu0 %vm158_vm0, %v394_v27  ;;  %355 = vmatmul.mubr.msk.bf16.vlgmr.msra.gmra.mrb[0].mxu1 %vm158_vm0, %v395_v28 }
  0x43   :  { %346 = vmatprep.mubr.msk.bf16.mxu0 %vm424_vm1, %v423_v1  ;;  %358 = vmatprep.mubr.msk.bf16.mxu1 %vm424_vm1, %v423_v1 }
  0x4a   :  { %347 = vmatmul.mubr.msk.bf16.gmra.mrb[4].mxu0 %vm158_vm0, %v396_v29  ;;  %359 = vmatmul.mubr.msk.bf16.gmra.mrb[4].mxu1 %vm158_vm0, %v397_v30 }
  0x4b   :  { %350 = vmatprep.mubr.msk.bf16.mxu0 %vm424_vm1, %v423_v1 }
  0x52   :  { %351 = vmatmul.mubr.msk.bf16.gmra.mrb[8].mxu0 %vm158_vm0, %v398_v31 }
  0x85   :  { %v53_v32 = vpop.permute.xlu0 %52  ;;  %v63_v33 = vpop.permute.xlu1 %62 }
  0x8c   :  { %v58_v34 = vpop.permute.xlu0 %57  ;;  %v68_v35 = vpop.permute.xlu1 %67 }
  0x90   :  { %v73_v36 = vpop.permute.xlu0 %72  ;;  %v78_v37 = vpop.permute.xlu1 %77 }
  0x94   :  { %v83_v38 = vpop.permute.xlu0 %82  ;;  %v88_v39 = vpop.permute.xlu1 %87 }
  0x98   :  { %v93_v52 = vpop.permute.xlu0 %92 }
 0x115   :  { %v232_v40 = vpop.f32.mrb[0].mxu0  ;;  %v256_v41 = vpop.f32.mrb[0].mxu1 }
 0x116   :  { %v233_v42 = vadd.f32 %v232_v40, %v53_v32  ;;  %v344_v43 = vpop.f32.mrb[1].mxu0  ;;  %v257_v44 = vadd.f32 %v256_v41, %v83_v38  ;;  %v356_v45 = vpop.f32.mrb[1].mxu1 }
 0x117   :  { %v235_v46 = vpop.f32.mrb[2].mxu0  ;;  %v259_v47 = vpop.f32.mrb[2].mxu1 }
 0x118   :  { %270 = vst [vmem:[#allocation2] sm:$0xff] %v233_v42  ;;  %v236_v48 = vadd.f32 %v235_v46, %v58_v34  ;;  %276 = vst [vmem:[#allocation2 + $0x30] sm:$0xff] %v257_v44  ;;  %v345_v49 = vpop.f32.mrb[3].mxu0  ;;  %v260_v50 = vadd.f32 %v259_v47, %v88_v39  ;;  %v357_v51 = vpop.f32.mrb[3].mxu1 }
 0x11a   :  { %271 = vst [vmem:[#allocation2 + $0x8] sm:$0xff] %v236_v48  ;;  %277 = vst [vmem:[#allocation2 + $0x38] sm:$0xff] %v260_v50 }
 0x11d   :  { %v240_v53 = vpop.f32.mrb[4].mxu0  ;;  %v264_v54 = vpop.f32.mrb[4].mxu1 }
 0x11e   :  { %v241_v55 = vadd.f32 %v240_v53, %v63_v33  ;;  %v265_v56 = vadd.f32 %v264_v54, %v93_v52  ;;  %v348_v57 = vpop.f32.mrb[5].mxu0  ;;  %v360_v58 = vpop.f32.mrb[5].mxu1 }
 0x11f   :  { %v243_v59 = vpop.f32.mrb[6].mxu0  ;;  %v267_v60 = vpop.f32.mrb[6].mxu1 }
 0x120   :  { %272 = vst [vmem:[#allocation2 + $0x10] sm:$0xff] %v241_v55  ;;  %278 = vst [vmem:[#allocation2 + $0x40] sm:$0xff] %v265_v56  ;;  %v244_v61 = vadd.f32 %v243_v59, %v68_v35  ;;  %v349_v62 = vpop.f32.mrb[7].mxu0  ;;  %v361_v63 = vpop.f32.mrb[7].mxu1 }
 0x122   :  { %273 = vst [vmem:[#allocation2 + $0x18] sm:$0xff] %v244_v61 }
 0x125   :  { %v248_v0 = vpop.f32.mrb[8].mxu0 }
 0x126   :  { %v249_v1 = vadd.f32 %v248_v0, %v73_v36  ;;  %v352_v2 = vpop.f32.mrb[9].mxu0 }
 0x127   :  { %v251_v3 = vpop.f32.mrb[10].mxu0 }
 0x128   :  { %274 = vst [vmem:[#allocation2 + $0x20] sm:$0xff] %v249_v1  ;;  %v252_v4 = vadd.f32 %v251_v3, %v78_v37  ;;  %v353_v5 = vpop.f32.mrb[11].mxu0 }
 0x12a   :  { %275 = vst [vmem:[#allocation2 + $0x28] sm:$0xff] %v252_v4 }
 0x12b   :  { %410 = shalt.err (!%p407_p4)
}
 0x12c   :  { %s411_s4 = scalar_lea.hbm %s569_s3, 1152 }
 0x12d   :  { %p412_p5 = scmp.ne.s32.totalorder %s569_s3, %s411_s4  ;;  %p415_p6 = scmp.lt.u32.totalorder %s411_s4, %s569_s3 }
 0x12f   :  { %p417_p7 = pnand %p415_p6, %p412_p5 }
 0x131   :  { %420 = shalt.err (!%p417_p7)
}
 0x132   :  { %s427_s9 = smov 128   ;;  %s428_s10 = smov 8  }
 0x133   :  { %290 = dma.vmem_to_hbm [thread:$0]  %s285_s27, 1152, %s569_s3, [#allocation3], %s427_s9, %s427_s9, %s428_s10  }
 0x134   :  { %421 = dma.done.wait [#allocation3], 1152  }
 0x135   :  { %422 = vsyncadd [#allocation3], 4294966144 }
 0x136   :  { %294 = vsyncpa [#allocation3], 1 }

</bundles_post_ra>
